<compile_context>
chip_gen: v7x
topology: tpu7x:2x2x1
jax: 0.10.0
libtpu: 0.0.40
codegen_flags: <defaults>
</compile_context>

<pallas_src>
import jax
import jax.numpy as jnp
from jax.experimental import pallas as pl
from jax.experimental.pallas import tpu as pltpu

_TARGET_BLOCK_BYTES = 4 << 20  # ~4 MiB per buffer (per input/output block)


def _swish_kernel(x_ref, o_ref):
    # Compute in f32 for accuracy; sigmoid via tanh: sigmoid(x) = 0.5*(tanh(x/2)+1)
    # -> one EUP transcendental per element (vs exp + divide + stability selects).
    xf = x_ref[...].astype(jnp.float32)
    sig = 0.5 * (jnp.tanh(0.5 * xf) + 1.0)
    o_ref[...] = (xf * sig).astype(o_ref.dtype)


def swish(x: jax.Array) -> jax.Array:
    """Elementwise swish: x * sigmoid(x). Works for arbitrary float input shapes."""
    orig_shape = x.shape
    dtype = x.dtype
    if not jnp.issubdtype(dtype, jnp.floating):
        # Matches PyTorch: Tensor.sigmoid() is not defined for integer dtypes.
        raise TypeError(f"swish expects a floating-point input, got {dtype}")

    total = x.size
    if total == 0:
        return x

    itemsize = jnp.dtype(dtype).itemsize
    sub = max(8, 32 // itemsize)  # packed-sublane multiple: 8 f32, 16 bf16, 32 fp8

    # Pick a lane-dense column width (multiple of 128) that divides the element
    # count exactly, so no pad/slice copies are needed in the common case.
    cols = None
    for c in (1024, 2048, 4096, 512, 256, 128):
        if total % c == 0:
            cols = c
            break

    x_flat = x.reshape(-1)
    if cols is None:
        # Ragged size: pad (< 128 extra elements); swish(0) == 0, so harmless.
        cols = 128
        padded_total = pl.cdiv(total, cols) * cols
        x_flat = jnp.pad(x_flat, (0, padded_total - total))
    else:
        padded_total = total

    rows = padded_total // cols
    x2d = x_flat.reshape(rows, cols)

    if rows <= 2 * sub:
        # Tiny input: one block covering the full array (divisibility waived).
        block_rows = rows
    else:
        # Constant-byte blocks across dtypes (~4 MiB), rounded to the sublane
        # packing multiple; cap at ~half the rows so the grid has >= 2 blocks
        # (feeds both TensorCores on v7x). Partial last blocks are fine.
        target_rows = max(sub, (_TARGET_BLOCK_BYTES // (cols * itemsize)) // sub * sub)
        half_rows = pl.cdiv(pl.cdiv(rows, 2), sub) * sub
        block_rows = min(target_rows, half_rows)

    grid = (pl.cdiv(rows, block_rows),)

    out = pl.pallas_call(
        _swish_kernel,
        out_shape=jax.ShapeDtypeStruct((rows, cols), dtype),
        grid_spec=pltpu.PrefetchScalarGridSpec(
            num_scalar_prefetch=0,
            grid=grid,
            in_specs=[pl.BlockSpec((block_rows, cols), lambda i: (i, 0))],
            out_specs=pl.BlockSpec((block_rows, cols), lambda i: (i, 0)),
        ),
        compiler_params=pltpu.CompilerParams(
            dimension_semantics=("parallel",),
            vmem_limit_bytes=32 * 1024 * 1024,
        ),
        cost_estimate=pl.CostEstimate(
            flops=3 * total,
            transcendentals=total,
            bytes_accessed=2 * total * itemsize,
        ),
    )(x2d)

    out_flat = out.reshape(-1)
    if padded_total != total:
        out_flat = out_flat[:total]
    return out_flat.reshape(orig_shape)


if __name__ == "__main__":
    key = jax.random.PRNGKey(0)

    # Shape consistent with typical ASR activations: (batch, seq, hidden).
    x = jax.random.normal(key, (2, 8, 128), dtype=jnp.float32)
    y = jax.block_until_ready(swish(x))
    y_ref = x * jax.nn.sigmoid(x)
    assert jnp.allclose(y, y_ref, atol=1e-6, rtol=1e-6), "f32 mismatch vs reference"

    # Non-divisible / odd shape exercises the ragged (pad) path.
    k1, k2 = jax.random.split(key)
    x_odd = jax.random.normal(k1, (3, 5, 7), dtype=jnp.float32)
    y_odd = jax.block_until_ready(swish(x_odd))
    y_odd_ref = x_odd * jax.nn.sigmoid(x_odd)
    assert jnp.allclose(y_odd, y_odd_ref, atol=1e-6, rtol=1e-6), "odd-shape mismatch"

    # bf16 path (packed sublanes handled by the full-array tiny-block path).
    x_bf = jax.random.normal(k2, (4, 33), dtype=jnp.bfloat16)
    y_bf = jax.block_until_ready(swish(x_bf))
    y_bf_ref = (x_bf.astype(jnp.float32) * jax.nn.sigmoid(x_bf.astype(jnp.float32))
                ).astype(jnp.bfloat16)
    assert jnp.allclose(y_bf.astype(jnp.float32), y_bf_ref.astype(jnp.float32),
                        atol=1e-2, rtol=1e-2), "bf16 mismatch"

    print("KERNEL_OK")
</pallas_src>

<mosaic_0001>
module attributes {stable_mosaic.version = 11 : i64} {
  func.func @_swish_kernel(%arg0: i32, %arg1: memref<2x1024xf32, #tpu.memory_space<vmem>>, %arg2: memref<2x1024xf32, #tpu.memory_space<vmem>>) attributes {dimension_semantics = [#tpu.dimension_semantics<parallel>], iteration_bounds = array<i64: 1>, scalar_prefetch = 0 : i64, scratch_operands = 0 : i64, tpu.core_type = #tpu.core_type<tc>, window_params = [{transform_indices = @transform_0, window_bounds = array<i64: 2, 1024>}, {transform_indices = @transform_1, window_bounds = array<i64: 2, 1024>}]} {
    %c0 = arith.constant 0 : index
    %c0_0 = arith.constant 0 : index
    %0 = vector.load %arg1[%c0, %c0_0] : memref<2x1024xf32, #tpu.memory_space<vmem>>, vector<2x1024xf32>
    %cst = arith.constant 5.000000e-01 : f32
    %1 = vector.broadcast %cst : f32 to vector<2x1024xf32>
    %2 = arith.mulf %1, %0 : vector<2x1024xf32>
    %3 = math.tanh %2 : vector<2x1024xf32>
    %cst_1 = arith.constant 1.000000e+00 : f32
    %4 = vector.broadcast %cst_1 : f32 to vector<2x1024xf32>
    %5 = arith.addf %3, %4 : vector<2x1024xf32>
    %cst_2 = arith.constant 5.000000e-01 : f32
    %6 = vector.broadcast %cst_2 : f32 to vector<2x1024xf32>
    %7 = arith.mulf %6, %5 : vector<2x1024xf32>
    %8 = arith.mulf %0, %7 : vector<2x1024xf32>
    %c0_3 = arith.constant 0 : index
    %c0_4 = arith.constant 0 : index
    %9 = vector.load %arg2[%c0_3, %c0_4] : memref<2x1024xf32, #tpu.memory_space<vmem>>, vector<2x1024xf32>
    tpu.vector_store %arg2[%c0_3, %c0_4], %8 {strides = array<i32>} : memref<2x1024xf32, #tpu.memory_space<vmem>>, vector<2x1024xf32>,
    return
  }
  func.func @transform_0(%arg0: i32) -> (i32, i32) {
    %c0_i32 = arith.constant 0 : i32
    %c0_i32_0 = arith.constant 0 : i32
    return %arg0, %c0_i32 : i32, i32
  }
  func.func @transform_1(%arg0: i32) -> (i32, i32) {
    %c0_i32 = arith.constant 0 : i32
    %c0_i32_0 = arith.constant 0 : i32
    return %arg0, %c0_i32 : i32, i32
  }
}

</mosaic_0001>

<bundles_post_ra>
// kernel: tpu_custom_call.1
= control target key start
LH: loop header
LB: loop body
LE: loop exit
PB: predicated region body
PF: predicated region fallthrough
CT: control target
= control target key end

     0   :  { %6 = vsyncpa [#allocation3], 0  ;;  %s140_s0 = inlined_call_operand.hbm [shape: f32[2,1024], index: 0, kind: input, shape index: {}]   ;;  %s141_s1 = inlined_call_operand.hbm [shape: f32[2,1024], index: 1, kind: output, shape index: {}]  }
   0x1   :  { %7 = vsyncpa [#allocation4], 0  ;;  %s104_s6 = smov [#allocation2]   ;;  %s56_s10 = scalar_lea.hbm %s140_s0, 256 }
   0x2   :  { %s14_s7 = sshll.u32 %s104_s6, 4  ;;  %p57_p0 = scmp.ne.s32.totalorder %s140_s0, %s56_s10  ;;  %s15_s7 = int_to_ptr.vmem [resolvable:$true] %s14_s7 }
   0x3   :  { %p60_p1 = scmp.lt.u32.totalorder %s56_s10, %s140_s0 }
   0x5   :  { %p62_p2 = pnand %p60_p1, %p57_p0 }
   0x7   :  { %65 = shalt.err (!%p62_p2)
}
   0x8   :  { %s66_s15 = scalar_lea.vmem %s15_s7, 256  ;;  %p71_p4 = scmp.lt.s32.totalorder %s15_s7, %s15_s7 }
   0x9   :  { %p67_p3 = scmp.ne.s32.totalorder %s15_s7, %s66_s15  ;;  %p72_p5 = scmp.lt.s32.totalorder %s66_s15, %s66_s15 }
   0xb   :  { %p73_p6 = por %p72_p5, %p71_p4 }
   0xd   :  { %p74_p7 = pnand %p73_p6, %p67_p3 }
   0xf   :  { %77 = shalt.err (!%p74_p7)
}
  0x10   :  { %17 = dma.hbm_to_vmem [thread:$0]  %s140_s0, 256, %s15_s7, [#allocation3]  }
  0x11   :  { %100 = dma.done.wait [#allocation3], 256  }
  0x12   :  { %101 = vsyncadd [#allocation3], 4294967040  ;;  %v21_v0 = vld [vmem:[#allocation2] sm:$0xff]  ;;  %v22_v1 = vld [vmem:[#allocation2 + $0x8] sm:$0xff]  ;;  %s105_s18 = smov [#allocation5]  }
  0x13   :  { %v23_v2 = vmul.f32 0.5, %v21_v0  ;;  %v24_v3 = vmul.f32 0.5, %v22_v1  ;;  %s41_s19 = sshll.u32 %s105_s18, 4  ;;  %s42_s19 = int_to_ptr.vmem [resolvable:$true] %s41_s19 }
  0x14   :  { %s78_s0 = scalar_lea.vmem %s42_s19, 256  ;;  %p83_p9 = scmp.lt.s32.totalorder %s42_s19, %s42_s19 }
  0x15   :  { %52 = vtanh.f32 %v23_v2  ;;  %p79_p8 = scmp.ne.s32.totalorder %s42_s19, %s78_s0  ;;  %p84_p10 = scmp.lt.s32.totalorder %s78_s0, %s78_s0 }
  0x16   :  { %54 = vtanh.f32 %v24_v3 }
  0x17   :  { %p85_p11 = por %p84_p10, %p83_p9 }
  0x19   :  { %p86_p12 = pnand %p85_p11, %p79_p8 }
  0x1f   :  { %v53_v4 = vpop.eup %52 }
  0x20   :  { %v55_v5 = vpop.eup %54  ;;  %v27_v6 = vadd.f32 1.0, %v53_v4 }
  0x21   :  { %v28_v7 = vadd.f32 1.0, %v55_v5 }
  0x22   :  { %v29_v8 = vmul.f32 0.5, %v27_v6 }
  0x23   :  { %v30_v9 = vmul.f32 0.5, %v28_v7 }
  0x24   :  { %v31_v10 = vmul.f32 %v29_v8, %v21_v0 }
  0x25   :  { %v32_v11 = vmul.f32 %v30_v9, %v22_v1 }
  0x26   :  { %33 = vst [vmem:[#allocation5] sm:$0xff] %v31_v10 }
  0x27   :  { %34 = vst [vmem:[#allocation5 + $0x8] sm:$0xff] %v32_v11 }
  0x28   :  { %89 = shalt.err (!%p86_p12)
}
  0x29   :  { %s90_s22 = scalar_lea.hbm %s141_s1, 256 }
  0x2a   :  { %p91_p13 = scmp.ne.s32.totalorder %s141_s1, %s90_s22  ;;  %p94_p0 = scmp.lt.u32.totalorder %s90_s22, %s141_s1 }
  0x2c   :  { %p96_p1 = pnand %p94_p0, %p91_p13 }
  0x2e   :  { %99 = shalt.err (!%p96_p1)
}
  0x2f   :  { %44 = dma.vmem_to_hbm [thread:$0]  %s42_s19, 256, %s141_s1, [#allocation4]  }
  0x30   :  { %102 = dma.done.wait [#allocation4], 256  }
  0x31   :  { %103 = vsyncadd [#allocation4], 4294967040 }
  0x32   :  { %48 = vsyncpa [#allocation3], 1 }
  0x33   :  { %49 = vsyncpa [#allocation4], 1 }

</bundles_post_ra>
